<compile_context>
chip_gen: v7x
topology: tpu7x:2x2x1
jax: 0.10.0
libtpu: 0.0.40
codegen_flags: <defaults>
</compile_context>

<pallas_src>
import jax
import jax.numpy as jnp
from jax.experimental import pallas as pl
from jax.experimental.pallas import tpu as pltpu

# ----- static layer geometry (fixed by the PyTorch module) -------------------
LAYER_DIMS = [(1, 128), (128, 256), (256, 128), (128, 64), (64, 1)]

# bf16 weight slab (384, 256):
#   fc2: (128, 256) at rows   0..127, cols 0..255
#   fc3: (256, 128) at rows 128..383, cols 0..127
#   fc4: (128,  64) at rows 128..255, cols 128..191  (read as a 128-lane block;
#        cols 192..255 are zeros and stay zero through bias + ReLU)
W_SLAB_SHAPE = (384, 256)

# f32 aux slab (8, 256): rank-1 weights + all biases, one row each.
AUX_SHAPE = (8, 256)
ROW_W1, ROW_W5T, ROW_B1, ROW_B2, ROW_B3, ROW_B4, ROW_B5 = range(7)


def _round_up(v, m):
    return (v + m - 1) // m * m


def pack_params(params):
    """Pack 5 (W, b) pairs (W as (in, out) = PyTorch W.T) into the two slabs.

    Biases may be shape (out,) or (1, out); both are handled.
    """
    (w1, b1), (w2, b2), (w3, b3), (w4, b4), (w5, b5) = [
        (jnp.asarray(w, jnp.float32), jnp.ravel(jnp.asarray(b, jnp.float32)))
        for (w, b) in params]

    w_slab = jnp.zeros(W_SLAB_SHAPE, jnp.float32)
    w_slab = w_slab.at[0:128, 0:256].set(w2)        # fc2
    w_slab = w_slab.at[128:384, 0:128].set(w3)      # fc3
    w_slab = w_slab.at[128:256, 128:192].set(w4)    # fc4 in fc3's spare lanes
    w_slab = w_slab.astype(jnp.bfloat16)            # bf16 MXU operands, 2x less DMA

    aux = jnp.zeros(AUX_SHAPE, jnp.float32)
    aux = aux.at[ROW_W1, 0:128].set(w1[0])          # fc1 weight as a row
    aux = aux.at[ROW_W5T, 0:64].set(w5[:, 0])       # fc5 weight, transposed
    aux = aux.at[ROW_B1, 0:128].set(b1)
    aux = aux.at[ROW_B2, 0:256].set(b2)
    aux = aux.at[ROW_B3, 0:128].set(b3)
    aux = aux.at[ROW_B4, 0:64].set(b4)
    aux = aux.at[ROW_B5, 0].set(b5[0])
    return w_slab, aux


def mlp_kernel(x_ref, w_ref, a_ref, o_ref):
    f32, bf16 = jnp.float32, jnp.bfloat16
    x = x_ref[...]                                    # (bm, 1) f32

    # fc1 (K=1): VPU broadcast multiply, no MXU push.
    w1 = a_ref[ROW_W1:ROW_W1 + 1, 0:128]              # (1, 128) f32
    b1 = a_ref[ROW_B1:ROW_B1 + 1, 0:128]
    h = jnp.maximum(x * w1 + b1, 0.0)                 # (bm, 128) f32

    # fc2: (bm,128) @ (128,256) -- bf16 operands, f32 accumulation.
    w2 = w_ref[0:128, 0:256]
    b2 = a_ref[ROW_B2:ROW_B2 + 1, 0:256]
    h = jnp.maximum(
        jnp.dot(h.astype(bf16), w2, preferred_element_type=f32) + b2, 0.0)

    # fc3: (bm,256) @ (256,128).
    w3 = w_ref[128:384, 0:128]
    b3 = a_ref[ROW_B3:ROW_B3 + 1, 0:128]
    h = jnp.maximum(
        jnp.dot(h.astype(bf16), w3, preferred_element_type=f32) + b3, 0.0)

    # fc4: (bm,128) @ (128,128); output cols 64..127 are zero padding (zero
    # weights + zero bias + ReLU keep them exactly zero), ignored by fc5 below.
    w4 = w_ref[128:256, 128:256]
    b4 = a_ref[ROW_B4:ROW_B4 + 1, 0:128]
    h = jnp.maximum(
        jnp.dot(h.astype(bf16), w4, preferred_element_type=f32) + b4, 0.0)

    # fc5 (N=1): VPU multiply + XLU lane-reduce instead of a skinny MXU dot.
    w5t = a_ref[ROW_W5T:ROW_W5T + 1, 0:128]           # (1, 128) f32, cols>=64 zero
    b5 = a_ref[ROW_B5:ROW_B5 + 1, 0:1]                # (1, 1) f32
    o_ref[...] = (jnp.sum(h * w5t, axis=-1, keepdims=True)
                  + b5).astype(o_ref.dtype)


def neural_network_forward(x, params, *, block_m=1024):
    """x: (N, 1) float. params: list of (W (in,out), b (out,) or (1,out))."""
    x = jnp.asarray(x, jnp.float32)
    n = x.shape[0]
    w_slab, aux = pack_params(params)

    # Batch tile: multiple of 8 sublanes, up to block_m rows (1 MiB f32 of
    # live activations per step at bm=1024 -- safe on v5e/v6e/v7x defaults).
    block_m = _round_up(block_m, 8)
    bm = min(block_m, _round_up(max(n, 1), 8))
    n_pad = _round_up(max(n, 1), bm)
    if n_pad != n:
        x = jnp.pad(x, ((0, n_pad - n), (0, 0)))
    grid = (n_pad // bm,)

    out = pl.pallas_call(
        mlp_kernel,
        out_shape=jax.ShapeDtypeStruct((n_pad, 1), jnp.float32),
        grid=grid,
        in_specs=[
            pl.BlockSpec((bm, 1), lambda i: (i, 0)),
            pl.BlockSpec(W_SLAB_SHAPE, lambda i: (0, 0)),   # VMEM-resident
            pl.BlockSpec(AUX_SHAPE, lambda i: (0, 0)),      # VMEM-resident
        ],
        out_specs=pl.BlockSpec((bm, 1), lambda i: (i, 0)),
        compiler_params=pltpu.CompilerParams(
            dimension_semantics=("parallel",)),   # megacore split across TCs
    )(x, w_slab, aux)
    return out[:n]


def init_params(key):
    """Deterministic init matching nn.Linear shapes (weights stored transposed)."""
    params = []
    for fan_in, fan_out in LAYER_DIMS:
        kw, kb, key = jax.random.split(key, 3)
        bound = 1.0 / jnp.sqrt(fan_in)
        w = jax.random.uniform(kw, (fan_in, fan_out), jnp.float32, -bound, bound)
        b = jax.random.uniform(kb, (1, fan_out), jnp.float32, -bound, bound)
        params.append((w, b))
    return params


def reference_forward(x, params, *, mirror_kernel_numerics=True):
    """Pure-JAX reference.  With mirror_kernel_numerics=True it reproduces the
    kernel's numerics exactly (bf16 MXU operands, f32 accumulation, f32
    bias/ReLU and f32 rank-1 layers)."""
    bf16, f32 = jnp.bfloat16, jnp.float32
    ws = [jnp.asarray(w, f32) for w, _ in params]
    bs = [jnp.ravel(jnp.asarray(b, f32)) for _, b in params]

    def dot(h, w):
        if mirror_kernel_numerics:
            return jnp.dot(h.astype(bf16), w.astype(bf16),
                           preferred_element_type=f32)
        return jnp.dot(h, w, preferred_element_type=f32)

    h = jnp.maximum(x * ws[0] + bs[0], 0.0)          # fc1 (K=1) in f32
    h = jnp.maximum(dot(h, ws[1]) + bs[1], 0.0)      # fc2
    h = jnp.maximum(dot(h, ws[2]) + bs[2], 0.0)      # fc3
    h = jnp.maximum(dot(h, ws[3]) + bs[3], 0.0)      # fc4
    return jnp.dot(h, ws[4], preferred_element_type=f32) + bs[4]   # fc5 in f32


if __name__ == "__main__":
    key = jax.random.PRNGKey(0)
    kx, kp = jax.random.split(key)

    N = 8
    x = jax.random.normal(kx, (N, 1), jnp.float32)
    params = init_params(kp)

    y = neural_network_forward(x, params)
    y = jax.block_until_ready(y)

    y_ref = reference_forward(x, params, mirror_kernel_numerics=True)
    assert y.shape == (N, 1)
    assert jnp.allclose(y, y_ref, atol=1e-3, rtol=1e-3), (
        float(jnp.max(jnp.abs(y - y_ref))))

    print("KERNEL_OK")
</pallas_src>

<mosaic_0001>
module attributes {stable_mosaic.version = 11 : i64} {
  func.func @mlp_kernel(%arg0: i32, %arg1: memref<8x1xf32, #tpu.memory_space<vmem>>, %arg2: memref<384x256xbf16, #tpu.memory_space<vmem>>, %arg3: memref<8x256xf32, #tpu.memory_space<vmem>>, %arg4: memref<8x1xf32, #tpu.memory_space<vmem>>) attributes {dimension_semantics = [#tpu.dimension_semantics<parallel>], iteration_bounds = array<i64: 1>, scalar_prefetch = 0 : i64, scratch_operands = 0 : i64, tpu.core_type = #tpu.core_type<tc>, window_params = [{transform_indices = @transform_0, window_bounds = array<i64: 8, 1>}, {pipeline_mode = #tpu.pipeline_mode<synchronous>, transform_indices = @transform_1, window_bounds = array<i64: 384, 256>}, {pipeline_mode = #tpu.pipeline_mode<synchronous>, transform_indices = @transform_2, window_bounds = array<i64: 8, 256>}, {transform_indices = @transform_3, window_bounds = array<i64: 8, 1>}]} {
    %c0 = arith.constant 0 : index
    %c0_0 = arith.constant 0 : index
    %0 = vector.load %arg1[%c0, %c0_0] : memref<8x1xf32, #tpu.memory_space<vmem>>, vector<8x1xf32>
    %c0_1 = arith.constant 0 : index
    %c0_2 = arith.constant 0 : index
    %1 = vector.load %arg3[%c0_1, %c0_2] : memref<8x256xf32, #tpu.memory_space<vmem>>, vector<1x128xf32>
    %c2 = arith.constant 2 : index
    %c0_3 = arith.constant 0 : index
    %2 = vector.load %arg3[%c2, %c0_3] : memref<8x256xf32, #tpu.memory_space<vmem>>, vector<1x128xf32>
    %3 = vector.broadcast %0 : vector<8x1xf32> to vector<8x128xf32>
    %4 = vector.broadcast %1 : vector<1x128xf32> to vector<8x128xf32>
    %5 = arith.mulf %3, %4 : vector<8x128xf32>
    %6 = vector.broadcast %2 : vector<1x128xf32> to vector<8x128xf32>
    %7 = arith.addf %5, %6 : vector<8x128xf32>
    %cst = arith.constant 0.000000e+00 : f32
    %8 = vector.broadcast %cst : f32 to vector<8x128xf32>
    %9 = arith.maximumf %7, %8 : vector<8x128xf32>
    %c0_4 = arith.constant 0 : index
    %c0_5 = arith.constant 0 : index
    %10 = vector.load %arg2[%c0_4, %c0_5] : memref<384x256xbf16, #tpu.memory_space<vmem>>, vector<128x256xbf16>
    %c3 = arith.constant 3 : index
    %c0_6 = arith.constant 0 : index
    %11 = vector.load %arg3[%c3, %c0_6] : memref<8x256xf32, #tpu.memory_space<vmem>>, vector<1x256xf32>
    %12 = arith.truncf %9 : vector<8x128xf32> to vector<8x128xbf16>
    %cst_7 = arith.constant dense<0.000000e+00> : vector<8x256xf32>
    %13 = tpu.matmul %12, %10, %cst_7 {dimension_numbers = #tpu.dot_dimension_numbers<[1], [0], [0], [1], [0, 0, 1, 1], [], []>} : vector<8x128xbf16>, vector<128x256xbf16>, vector<8x256xf32> -> vector<8x256xf32>
    %14 = vector.broadcast %11 : vector<1x256xf32> to vector<8x256xf32>
    %15 = arith.addf %13, %14 : vector<8x256xf32>
    %cst_8 = arith.constant 0.000000e+00 : f32
    %16 = vector.broadcast %cst_8 : f32 to vector<8x256xf32>
    %17 = arith.maximumf %15, %16 : vector<8x256xf32>
    %c128 = arith.constant 128 : index
    %c0_9 = arith.constant 0 : index
    %18 = vector.load %arg2[%c128, %c0_9] : memref<384x256xbf16, #tpu.memory_space<vmem>>, vector<256x128xbf16>
    %c4 = arith.constant 4 : index
    %c0_10 = arith.constant 0 : index
    %19 = vector.load %arg3[%c4, %c0_10] : memref<8x256xf32, #tpu.memory_space<vmem>>, vector<1x128xf32>
    %20 = arith.truncf %17 : vector<8x256xf32> to vector<8x256xbf16>
    %cst_11 = arith.constant dense<0.000000e+00> : vector<8x128xf32>
    %21 = tpu.matmul %20, %18, %cst_11 {dimension_numbers = #tpu.dot_dimension_numbers<[1], [0], [0], [1], [0, 0, 1, 1], [], []>} : vector<8x256xbf16>, vector<256x128xbf16>, vector<8x128xf32> -> vector<8x128xf32>
    %22 = vector.broadcast %19 : vector<1x128xf32> to vector<8x128xf32>
    %23 = arith.addf %21, %22 : vector<8x128xf32>
    %cst_12 = arith.constant 0.000000e+00 : f32
    %24 = vector.broadcast %cst_12 : f32 to vector<8x128xf32>
    %25 = arith.maximumf %23, %24 : vector<8x128xf32>
    %c128_13 = arith.constant 128 : index
    %c128_14 = arith.constant 128 : index
    %26 = vector.load %arg2[%c128_13, %c128_14] : memref<384x256xbf16, #tpu.memory_space<vmem>>, vector<128x128xbf16>
    %c5 = arith.constant 5 : index
    %c0_15 = arith.constant 0 : index
    %27 = vector.load %arg3[%c5, %c0_15] : memref<8x256xf32, #tpu.memory_space<vmem>>, vector<1x128xf32>
    %28 = arith.truncf %25 : vector<8x128xf32> to vector<8x128xbf16>
    %cst_16 = arith.constant dense<0.000000e+00> : vector<8x128xf32>
    %29 = tpu.matmul %28, %26, %cst_16 {dimension_numbers = #tpu.dot_dimension_numbers<[1], [0], [0], [1], [0, 0, 1, 1], [], []>} : vector<8x128xbf16>, vector<128x128xbf16>, vector<8x128xf32> -> vector<8x128xf32>
    %30 = vector.broadcast %27 : vector<1x128xf32> to vector<8x128xf32>
    %31 = arith.addf %29, %30 : vector<8x128xf32>
    %cst_17 = arith.constant 0.000000e+00 : f32
    %32 = vector.broadcast %cst_17 : f32 to vector<8x128xf32>
    %33 = arith.maximumf %31, %32 : vector<8x128xf32>
    %c1 = arith.constant 1 : index
    %c0_18 = arith.constant 0 : index
    %34 = vector.load %arg3[%c1, %c0_18] : memref<8x256xf32, #tpu.memory_space<vmem>>, vector<1x128xf32>
    %c6 = arith.constant 6 : index
    %c0_19 = arith.constant 0 : index
    %35 = vector.load %arg3[%c6, %c0_19] : memref<8x256xf32, #tpu.memory_space<vmem>>, vector<1x1xf32>
    %36 = vector.broadcast %34 : vector<1x128xf32> to vector<8x128xf32>
    %37 = arith.mulf %33, %36 : vector<8x128xf32>
    %cst_20 = arith.constant dense<0.000000e+00> : vector<8xf32>
    %38 = vector.multi_reduction <add>, %37, %cst_20 [1] : vector<8x128xf32> to vector<8xf32>
    %39 = vector.shape_cast %38 : vector<8xf32> to vector<8x1xf32>
    %40 = vector.broadcast %35 : vector<1x1xf32> to vector<8x1xf32>
    %41 = arith.addf %39, %40 : vector<8x1xf32>
    %c0_21 = arith.constant 0 : index
    %c0_22 = arith.constant 0 : index
    %42 = vector.load %arg4[%c0_21, %c0_22] : memref<8x1xf32, #tpu.memory_space<vmem>>, vector<8x1xf32>
    tpu.vector_store %arg4[%c0_21, %c0_22], %41 {strides = array<i32>} : memref<8x1xf32, #tpu.memory_space<vmem>>, vector<8x1xf32>,
    return
  }
  func.func @transform_0(%arg0: i32) -> (i32, i32) {
    %c0_i32 = arith.constant 0 : i32
    %c0_i32_0 = arith.constant 0 : i32
    return %arg0, %c0_i32 : i32, i32
  }
  func.func @transform_1(%arg0: i32) -> (i32, i32) {
    %c0_i32 = arith.constant 0 : i32
    %c0_i32_0 = arith.constant 0 : i32
    %c0_i32_1 = arith.constant 0 : i32
    return %c0_i32, %c0_i32_0 : i32, i32
  }
  func.func @transform_2(%arg0: i32) -> (i32, i32) {
    %c0_i32 = arith.constant 0 : i32
    %c0_i32_0 = arith.constant 0 : i32
    %c0_i32_1 = arith.constant 0 : i32
    return %c0_i32, %c0_i32_0 : i32, i32
  }
  func.func @transform_3(%arg0: i32) -> (i32, i32) {
    %c0_i32 = arith.constant 0 : i32
    %c0_i32_0 = arith.constant 0 : i32
    return %arg0, %c0_i32 : i32, i32
  }
}

</mosaic_0001>

<bundles_post_ra>
// kernel: tpu_custom_call.1
= control target key start
LH: loop header
LB: loop body
LE: loop exit
PB: predicated region body
PF: predicated region fallthrough
CT: control target
= control target key end

     0   :  { %8 = vsyncpa [#allocation3], 0  ;;  %s656_s12 = smov [#allocation2]   ;;  %s721_s0 = inlined_call_operand.vmem [shape: f32[8,1], index: 0, kind: input, shape index: {}]   ;;  %s722_s1 = inlined_call_operand.hbm [shape: bf16[384,256], index: 1, kind: input, shape index: {}]   ;;  %s723_s2 = inlined_call_operand.vmem [shape: f32[8,256], index: 2, kind: input, shape index: {}]   ;;  %s724_s3 = inlined_call_operand.vmem [shape: f32[8,1], index: 3, kind: output, shape index: {}]  }
   0x1   :  { %s16_s13 = sshll.u32 %s656_s12, 4  ;;  %s632_s16 = scalar_lea.hbm %s722_s1, 6144  ;;  %s17_s13 = int_to_ptr.vmem [resolvable:$true] %s16_s13 }
   0x2   :  { %p633_p0 = scmp.ne.s32.totalorder %s722_s1, %s632_s16  ;;  %p636_p1 = scmp.lt.u32.totalorder %s632_s16, %s722_s1 }
   0x4   :  { %p638_p2 = pnand %p636_p1, %p633_p0 }
   0x6   :  { %641 = shalt.err (!%p638_p2)
}
   0x7   :  { %s642_s21 = scalar_lea.vmem %s17_s13, 6144  ;;  %p647_p4 = scmp.lt.s32.totalorder %s17_s13, %s17_s13 }
   0x8   :  { %p643_p3 = scmp.ne.s32.totalorder %s17_s13, %s642_s21  ;;  %p648_p5 = scmp.lt.s32.totalorder %s642_s21, %s642_s21 }
   0xa   :  { %p649_p6 = por %p648_p5, %p647_p4 }
   0xc   :  { %p650_p7 = pnand %p649_p6, %p643_p3 }
   0xe   :  { %653 = shalt.err (!%p650_p7)
}
   0xf   :  { %s657_s22 = smov 128   ;;  %s658_s23 = smov 8  }
  0x10   :  { %22 = dma.hbm_to_vmem [thread:$0]  %s722_s1, 6144, %s17_s13, [#allocation3], %s657_s22, %s657_s22, %s658_s23  }
  0x11   :  { %654 = dma.done.wait [#allocation3], 6144  }
  0x12   :  { %655 = vsyncadd [#allocation3], 4294961152  ;;  %v659_v0 = vmov 0   ;;  %v29_v1 = vld [vmem:[%s721_s0] sm:$0xff]  ;;  %v584_v2 = vld [vmem:[#allocation2 + $0x4] ss:$8 sps:$4 sm:$0xff]   ;;  %v60_v48 = vlaneseq }
  0x13   :  { %583 = vset.pattern.permute.xlu0 %v659_v0  ;;  %182 = vmatprep.mubr.bf16.mxu0 %v659_v0  ;;  %v586_v3 = vld [vmem:[#allocation2] ss:$8 sps:$4 sm:$0xff]   ;;  %v587_v4 = vld [vmem:[#allocation2 + $0x14] ss:$8 sps:$4 sm:$0xff]   ;;  %v589_v5 = vld [vmem:[#allocation2 + $0x10] ss:$8 sps:$4 sm:$0xff]  }
  0x14   :  { %34 = vperm.xlu0 %583, %v29_v1   ;;  %150 = vmatprep.subr.bf16.mxu0 %v584_v2  ;;  %v590_v6 = vld [vmem:[#allocation2 + $0x24] ss:$8 sps:$4 sm:$0xff]   ;;  %v592_v7 = vld [vmem:[#allocation2 + $0x20] ss:$8 sps:$4 sm:$0xff]   ;;  %v593_v8 = vld [vmem:[#allocation2 + $0x34] ss:$8 sps:$4 sm:$0xff]  }
  0x15   :  { %151 = vmatpush1.bf16.msra.mxu0 %v586_v3  ;;  %v595_v9 = vld [vmem:[#allocation2 + $0x30] ss:$8 sps:$4 sm:$0xff]   ;;  %v596_v10 = vld [vmem:[#allocation2 + $0x44] ss:$8 sps:$4 sm:$0xff]   ;;  %v608_v11 = vld [vmem:[#allocation2 + $0x100] ss:$8 sps:$4 sm:$0xff]  }
  0x16   :  { %152 = vmatprep.subr.bf16.mxu0 %v587_v4  ;;  %v609_v12 = vld [vmem:[#allocation2 + $0x80] ss:$8 sps:$4 sm:$0xff]   ;;  %526 = vmatprep.subr.bf16.mxu1 %v608_v11  ;;  %v610_v14 = vld [vmem:[#allocation2 + $0x110] ss:$8 sps:$4 sm:$0xff]   ;;  %v599_v17 = vld [vmem:[#allocation2 + $0x54] ss:$8 sps:$4 sm:$0xff]  }
  0x17   :  { %v598_v13 = vld [vmem:[#allocation2 + $0x40] ss:$8 sps:$4 sm:$0xff]   ;;  %527 = vmatpush3.bf16.msra.mxu1 %v609_v12  ;;  %v611_v15 = vld [vmem:[#allocation2 + $0x90] ss:$8 sps:$4 sm:$0xff]   ;;  %v602_v21 = vld [vmem:[#allocation2 + $0x64] ss:$8 sps:$4 sm:$0xff]  }
  0x18   :  { %528 = vmatprep.subr.bf16.mxu1 %v610_v14  ;;  %v612_v16 = vld [vmem:[#allocation2 + $0x120] ss:$8 sps:$4 sm:$0xff]   ;;  %v601_v18 = vld [vmem:[#allocation2 + $0x50] ss:$8 sps:$4 sm:$0xff]   ;;  %v605_v24 = vld [vmem:[#allocation2 + $0x74] ss:$8 sps:$4 sm:$0xff]  }
  0x19   :  { %153 = vmatpush1.bf16.msra.mxu0 %v589_v5  ;;  %v613_v19 = vld [vmem:[#allocation2 + $0xa0] ss:$8 sps:$4 sm:$0xff]   ;;  %v614_v20 = vld [vmem:[#allocation2 + $0x130] ss:$8 sps:$4 sm:$0xff]   ;;  %v624_v41 = vld [vmem:[#allocation2 + $0x84] ss:$8 sps:$4 sm:$0xff]  }
  0x1a   :  { %154 = vmatprep.subr.bf16.mxu0 %v590_v6  ;;  %v604_v22 = vld [vmem:[#allocation2 + $0x60] ss:$8 sps:$4 sm:$0xff]   ;;  %v615_v23 = vld [vmem:[#allocation2 + $0xb0] ss:$8 sps:$4 sm:$0xff]   ;;  %v660_v42 = vmov 0.0   ;;  %v61_v49 = vshrl.u32 %v60_v48, 7 }
  0x1b   :  { %529 = vmatpush3.bf16.msra.mxu1 %v611_v15  ;;  %v616_v25 = vld [vmem:[#allocation2 + $0x140] ss:$8 sps:$4 sm:$0xff]   ;;  %v607_v27 = vld [vmem:[#allocation2 + $0x70] ss:$8 sps:$4 sm:$0xff]   ;;  %v625_v43 = vld [vmem:[#allocation2 + $0x94] ss:$8 sps:$4 sm:$0xff]  }
  0x1c   :  { %530 = vmatprep.subr.bf16.mxu1 %v612_v16  ;;  %v617_v26 = vld [vmem:[#allocation2 + $0xc0] ss:$8 sps:$4 sm:$0xff]   ;;  %v618_v28 = vld [vmem:[#allocation2 + $0x150] ss:$8 sps:$4 sm:$0xff]   ;;  %v626_v44 = vld [vmem:[#allocation2 + $0xa4] ss:$8 sps:$4 sm:$0xff]  }
  0x1d   :  { %155 = vmatpush1.bf16.msra.mxu0 %v592_v7  ;;  %v619_v29 = vld [vmem:[#allocation2 + $0xd0] ss:$8 sps:$4 sm:$0xff]   ;;  %v620_v37 = vld [vmem:[#allocation2 + $0x160] ss:$8 sps:$4 sm:$0xff]   ;;  %v627_v45 = vld [vmem:[#allocation2 + $0xb4] ss:$8 sps:$4 sm:$0xff]  }
  0x1e   :  { %156 = vmatprep.subr.bf16.mxu0 %v593_v8  ;;  %v30_v30 = vld [vmem:[%s723_s2] ss:$0 sm:$0xff]  ;;  %v31_v31 = vld [vmem:[%s723_s2 + $0x2] ss:$0 sm:$0xff]  ;;  %v621_v38 = vld [vmem:[#allocation2 + $0xe0] ss:$8 sps:$4 sm:$0xff]  }
  0x1f   :  { %531 = vmatpush3.bf16.msra.mxu1 %v613_v19  ;;  %v622_v39 = vld [vmem:[#allocation2 + $0x170] ss:$8 sps:$4 sm:$0xff]   ;;  %v628_v46 = vld [vmem:[#allocation2 + $0xc4] ss:$8 sps:$4 sm:$0xff]   ;;  %v629_v47 = vld [vmem:[#allocation2 + $0xd4] ss:$8 sps:$4 sm:$0xff]  }
  0x20   :  { %532 = vmatprep.subr.bf16.mxu1 %v614_v20  ;;  %v623_v40 = vld [vmem:[#allocation2 + $0xf0] ss:$8 sps:$4 sm:$0xff]   ;;  %v62_v50 = vsub.s32 0, %v61_v49  ;;  %v66_v52 = vsub.s32 1, %v61_v49  ;;  %v630_v1 = vld [vmem:[#allocation2 + $0xe4] ss:$8 sps:$4 sm:$0xff]  }
  0x21   :  { %157 = vmatpush1.bf16.msra.mxu0 %v595_v9  ;;  %v485_v51 = vld [vmem:[%s723_s2 + $0x3] ss:$8 sm:$0x3]  ;;  %v631_v2 = vld [vmem:[#allocation2 + $0xf4] ss:$8 sps:$4 sm:$0xff]   ;;  %vm661_vm0 = vmmov 0  }
  0x22   :  { %158 = vmatprep.subr.bf16.mxu0 %v596_v10  ;;  %v63_v53 = vrot.slane %v485_v51, %v62_v50  ;;  %v67_v54 = vrot.slane %v485_v51, %v66_v52  ;;  %v225_v4 = vld [vmem:[%s723_s2 + $0x4] ss:$0 sm:$0xff]  ;;  %v381_v12 = vld [vmem:[%s723_s2 + $0x5] ss:$0 sm:$0xff]  ;;  %vm478_vm1 = vcmask 7168  }
  0x23   :  { %533 = vmatpush3.bf16.msra.mxu1 %v615_v23 }
  0x24   :  { %534 = vmatprep.subr.bf16.mxu1 %v616_v25 }
  0x25   :  { %159 = vmatpush1.bf16.msra.mxu0 %v598_v13 }
  0x26   :  { %160 = vmatprep.subr.bf16.mxu0 %v599_v17  ;;  %v472_v17 = vld [vmem:[%s723_s2 + $0x1] ss:$0 sm:$0xff] }
  0x27   :  { %535 = vmatpush3.bf16.msra.mxu1 %v617_v26 }
  0x28   :  { %536 = vmatprep.subr.bf16.mxu1 %v618_v28 }
  0x29   :  { %161 = vmatpush1.bf16.msra.mxu0 %v601_v18 }
  0x2a   :  { %162 = vmatprep.subr.bf16.mxu0 %v602_v21  ;;  %v473_v21 = vld [vmem:[%s723_s2 + $0x6] ss:$0 sm:$0xff] }
  0x2b   :  { %537 = vmatpush3.bf16.msra.mxu1 %v619_v29 }
  0x2c   :  { %538 = vmatprep.subr.bf16.mxu1 %v620_v37 }
  0x2d   :  { %163 = vmatpush1.bf16.msra.mxu0 %v604_v22 }
  0x2e   :  { %164 = vmatprep.subr.bf16.mxu0 %v605_v24 }
  0x2f   :  { %539 = vmatpush3.bf16.msra.mxu1 %v621_v38 }
  0x30   :  { %540 = vmatprep.subr.bf16.mxu1 %v622_v39 }
  0x31   :  { %165 = vmatpush1.bf16.msra.mxu0 %v607_v27 }
  0x32   :  { %557 = vmatprep.subr.bf16.mxu0 %v660_v42 }
  0x33   :  { %541 = vmatpush3.bf16.msra.mxu1 %v623_v40 }
  0x93   :  { %v35_v32 = vpop.permute.xlu0 %34 }
  0x94   :  { %v37_v33 = vmul.f32 %v35_v32, %v30_v30 }
  0x96   :  { %v38_v34 = vadd.f32 %v37_v33, %v31_v31 }
  0x98   :  { %v39_v35 = vmax.f32 %v38_v34, 0.0 }
  0x9a   :  { %v58_v36 = vpack.c.bf16 %v39_v35, %v39_v35 }
  0x9c   :  { %183 = vmatmul.mubr.bf16.vlgmr.msra.gmra.mrb[0].mxu0 %v58_v36 }
  0x9d   :  { %558 = vmatpush3.bf16.msra.mxu0 %v624_v41  ;;  %573 = vmatprep.mubr.msk.bf16.mxu0 %vm661_vm0, %v660_v42 }
  0x9e   :  { %559 = vmatprep.subr.bf16.mxu0 %v660_v42 }
  0xa1   :  { %560 = vmatpush3.bf16.msra.mxu0 %v625_v43 }
  0xa2   :  { %561 = vmatprep.subr.bf16.mxu0 %v660_v42 }
  0xa5   :  { %562 = vmatpush3.bf16.msra.mxu0 %v626_v44 }
  0xa6   :  { %563 = vmatprep.subr.bf16.mxu0 %v660_v42 }
  0xa9   :  { %564 = vmatpush3.bf16.msra.mxu0 %v627_v45 }
  0xaa   :  { %565 = vmatprep.subr.bf16.mxu0 %v660_v42 }
  0xad   :  { %566 = vmatpush3.bf16.msra.mxu0 %v628_v46 }
  0xae   :  { %567 = vmatprep.subr.bf16.mxu0 %v660_v42 }
  0xb1   :  { %568 = vmatpush3.bf16.msra.mxu0 %v629_v47 }
  0xb2   :  { %569 = vmatprep.subr.bf16.mxu0 %v660_v42 }
  0xb5   :  { %570 = vmatpush3.bf16.msra.mxu0 %v630_v1 }
  0xb6   :  { %571 = vmatprep.subr.bf16.mxu0 %v660_v42 }
  0xb9   :  { %572 = vmatpush3.bf16.msra.mxu0 %v631_v2 }
 0x16f   :  { %v184_v55 = vpop.f32.mrb[0].mxu0 }
 0x170   :  { %v185_v56 = vadd.f32 %v184_v55, %v63_v53  ;;  %v186_v57 = vpop.f32.mrb[1].mxu0 }
 0x171   :  { %v187_v58 = vadd.f32 %v186_v57, %v67_v54  ;;  %v188_v59 = vpop.f32.mrb[2].mxu0 }
 0x172   :  { %v191_v60 = vmax.f32 %v185_v56, 0.0  ;;  %v189_v61 = vpop.f32.mrb[3].mxu0 }
 0x173   :  { %v192_v62 = vmax.f32 %v187_v58, 0.0 }
 0x174   :  { %v226_v0 = vpack.c.bf16 %v191_v60, %v191_v60 }
 0x175   :  { %v227_v63 = vpack.c.bf16 %v192_v62, %v192_v62 }
 0x177   :  { %356 = vmatprep.mubr.bf16.mxu1 %v227_v63 }
 0x178   :  { %357 = vmatmul.mubr.bf16.vlgmr.msra.gmra.mrb[0].mxu1 %v226_v0 }
 0x24b   :  { %v542_v3 = vpop.f32.mrb[0].mxu1 }
 0x24c   :  { %v543_v5 = vpop.f32.mrb[1].mxu1 }
 0x24d   :  { %v544_v6 = vadd.f32 %v543_v5, %v542_v3  ;;  %v545_v7 = vpop.f32.mrb[2].mxu1 }
 0x24e   :  { %v546_v8 = vpop.f32.mrb[3].mxu1 }
 0x24f   :  { %v359_v9 = vadd.f32 %v544_v6, %v225_v4 }
 0x251   :  { %v364_v10 = vmax.f32 %v359_v9, 0.0 }
 0x253   :  { %v382_v11 = vpack.c.bf16 %v364_v10, %v364_v10 }
 0x255   :  { %574 = vmatmul.mubr.bf16.vlgmr.msra.gmra.mrb[4].mxu0 %v382_v11 }
 0x328   :  { %v465_v13 = vpop.f32.mrb[4].mxu0 }
 0x329   :  { %v466_v14 = vadd.f32 %v465_v13, %v381_v12  ;;  %v575_v15 = vpop.f32.mrb[5].mxu0 }
 0x32a   :  { %v468_v16 = vpop.f32.mrb[6].mxu0 }
 0x32b   :  { %v471_v18 = vmax.f32 %v466_v14, 0.0  ;;  %v576_v19 = vpop.f32.mrb[7].mxu0 }
 0x32d   :  { %v474_v20 = vmul.f32 %v472_v17, %v471_v18 }
 0x32f   :  { %475 = vadd.xlane.f32.xlu0 %v474_v20 }
 0x3bc   :  { %v476_v22 = vpop.xlane.xlu0 %475 }
 0x3bd   :  { %v477_v23 = vadd.f32 %v476_v22, %v473_v21 }
 0x3bf   :  { %479 = vst.msk [vmem:[%s724_s3] sm:$0xff] %vm478_vm1, %v477_v23 }
 0x3c0   :  { %484 = vsyncpa [#allocation3], 1 }

</bundles_post_ra>
